<compile_context>
chip_gen: v5e
topology: v5e:2x2
jax: 0.10.0
libtpu: 0.0.40
codegen_flags: <defaults>
</compile_context>

<pallas_src>
import functools

import jax
import jax.numpy as jnp
from jax import lax
from jax.experimental import pallas as pl
from jax.experimental.pallas import tpu as pltpu


def _global_att_blocks_kernel(x_ref, wqkv_ref, wffn_ref, bffn_ref, state_ref,
                              *, num_heads):
    b = pl.program_id(0)

    # Initialize the carried residual stream from the input on the first block.
    @pl.when(b == 0)
    def _():
        state_ref[...] = x_ref[...]

    x = state_ref[...].astype(jnp.float32)                    # (N, D)
    n, d = x.shape
    hd = d // num_heads

    # Fused Q/K/V projection: one MXU matmul instead of three.
    qkv = jnp.dot(x, wqkv_ref[...], preferred_element_type=jnp.float32)  # (N, 3D)
    q = qkv[:, 0 * d:1 * d]
    k = qkv[:, 1 * d:2 * d]
    v = qkv[:, 2 * d:3 * d]

    # Per-head tanh attention with the FFN folded in:
    #   concat_h(O_h) @ Wffn == sum_h O_h @ Wffn[h*hd:(h+1)*hd, :]
    # -> no concatenate / head stacking, just accumulating matmuls.
    contract_last = (((1,), (1,)), ((), ()))                  # A . B^T without explicit transpose
    acc = None
    for h in range(num_heads):
        sl = slice(h * hd, (h + 1) * hd)
        s_h = jnp.tanh(lax.dot_general(q[:, sl], k[:, sl], contract_last,
                                       preferred_element_type=jnp.float32))      # (N, N)
        o_h = jnp.dot(s_h, v[:, sl], preferred_element_type=jnp.float32)         # (N, hd)
        term = jnp.dot(o_h, wffn_ref[sl, :], preferred_element_type=jnp.float32)  # (N, D)
        acc = term if acc is None else acc + term

    att_hidden = jnp.maximum(acc + bffn_ref[...], 0.0)        # bias added once, then ReLU
    state_ref[...] = (x + att_hidden).astype(state_ref.dtype)  # residual update carried to next block


def global_att_blocks(x, wq, wk, wv, wffn, bffn, *, num_heads):
    """x: (N, D) f32.  wq/wk/wv/wffn: (num_blocks, D, D), pre-transposed to
    (in, out) so the kernel computes x @ W (== PyTorch x @ W.T for nn.Linear).
    bffn: (num_blocks, 1, D).  Returns the final residual stream (N, D)."""
    n, d = x.shape
    num_blocks = wq.shape[0]
    assert num_blocks >= 1
    assert d % num_heads == 0, "hidden_size must be divisible by num_heads"
    assert wq.shape == wk.shape == wv.shape == wffn.shape == (num_blocks, d, d)
    assert bffn.shape == (num_blocks, 1, d)

    # Layout plumbing in the wrapper: fuse the three projection weights so the
    # kernel does a single (N, D) @ (D, 3D) matmul per block.
    wqkv = jnp.concatenate([wq, wk, wv], axis=-1)             # (num_blocks, D, 3D)

    kernel = functools.partial(_global_att_blocks_kernel, num_heads=num_heads)
    full2d = lambda shp: pl.BlockSpec(shp, lambda b: (0, 0))
    per_block = lambda shp: pl.BlockSpec((None,) + shp, lambda b: (b, 0, 0))

    return pl.pallas_call(
        kernel,
        out_shape=jax.ShapeDtypeStruct((n, d), jnp.float32),
        grid=(num_blocks,),
        in_specs=[
            full2d((n, d)),              # x (only consumed at block 0)
            per_block((d, 3 * d)),       # fused Wqkv of block b
            per_block((d, d)),           # Wffn of block b
            per_block((1, d)),           # b_ffn of block b
        ],
        # Same output block for every b -> resident accumulator across the
        # whole "arbitrary" grid axis; written back to HBM once at the end.
        out_specs=full2d((n, d)),
        compiler_params=pltpu.CompilerParams(
            dimension_semantics=("arbitrary",)),
    )(x, wqkv, wffn, bffn)


def _reference(x, wq, wk, wv, wffn, bffn, num_heads):
    def one_block(xb, wq_b, wk_b, wv_b, wffn_b, bffn_b):
        n, d = xb.shape
        hd = d // num_heads
        q = (xb @ wq_b).reshape(n, num_heads, hd).transpose(1, 0, 2)
        k = (xb @ wk_b).reshape(n, num_heads, hd).transpose(1, 0, 2)
        v = (xb @ wv_b).reshape(n, num_heads, hd).transpose(1, 0, 2)
        s = jnp.tanh(jnp.einsum("hqd,hkd->hqk", q, k))
        att = jnp.einsum("hqk,hkd->hqd", s, v).transpose(1, 0, 2).reshape(n, d)
        att_hidden = jnp.maximum(att @ wffn_b + bffn_b[0], 0.0)
        return xb + att_hidden

    out = x
    for b in range(wq.shape[0]):
        out = one_block(out, wq[b], wk[b], wv[b], wffn[b], bffn[b])
    return out


if __name__ == "__main__":
    hidden_size = 32
    num_heads = 4
    seq_len = 8
    num_blocks = 3

    key = jax.random.PRNGKey(0)
    kx, kq, kk, kv, kw, kb = jax.random.split(key, 6)
    bound = 1.0 / (hidden_size ** 0.5)   # ~nn.Linear uniform init range

    x = jax.random.normal(kx, (seq_len, hidden_size), dtype=jnp.float32)
    wq = jax.random.uniform(kq, (num_blocks, hidden_size, hidden_size),
                            jnp.float32, -bound, bound)
    wk = jax.random.uniform(kk, (num_blocks, hidden_size, hidden_size),
                            jnp.float32, -bound, bound)
    wv = jax.random.uniform(kv, (num_blocks, hidden_size, hidden_size),
                            jnp.float32, -bound, bound)
    wffn = jax.random.uniform(kw, (num_blocks, hidden_size, hidden_size),
                              jnp.float32, -bound, bound)
    bffn = jax.random.uniform(kb, (num_blocks, 1, hidden_size),
                              jnp.float32, -bound, bound)

    out = global_att_blocks(x, wq, wk, wv, wffn, bffn, num_heads=num_heads)
    jax.block_until_ready(out)

    ref = _reference(x, wq, wk, wv, wffn, bffn, num_heads)
    max_err = float(jnp.max(jnp.abs(out - ref)))
    assert jnp.allclose(out, ref, atol=1e-4, rtol=1e-4), max_err
    print("KERNEL_OK")
</pallas_src>

<mosaic_0001>
module attributes {stable_mosaic.version = 11 : i64} {
  func.func @_global_att_blocks_kernel(%arg0: i32, %arg1: memref<8x32xf32, #tpu.memory_space<vmem>>, %arg2: memref<1x32x96xf32, #tpu.memory_space<vmem>>, %arg3: memref<1x32x32xf32, #tpu.memory_space<vmem>>, %arg4: memref<1x1x32xf32, #tpu.memory_space<vmem>>, %arg5: memref<8x32xf32, #tpu.memory_space<vmem>>) attributes {dimension_semantics = [#tpu.dimension_semantics<arbitrary>], iteration_bounds = array<i64: 3>, scalar_prefetch = 0 : i64, scratch_operands = 0 : i64, tpu.core_type = #tpu.core_type<tc>, window_params = [{pipeline_mode = #tpu.pipeline_mode<synchronous>, transform_indices = @transform_0, window_bounds = array<i64: 8, 32>}, {transform_indices = @transform_1, window_bounds = array<i64: 1, 32, 96>}, {transform_indices = @transform_2, window_bounds = array<i64: 1, 32, 32>}, {transform_indices = @transform_3, window_bounds = array<i64: 1, 1, 32>}, {pipeline_mode = #tpu.pipeline_mode<synchronous>, transform_indices = @transform_4, window_bounds = array<i64: 8, 32>}]} {
    %c0_i32 = arith.constant 0 : i32
    %0 = arith.cmpi eq, %arg0, %c0_i32 : i32
    %1 = arith.extui %0 : i1 to i32
    %c0_i32_0 = arith.constant 0 : i32
    %2 = arith.cmpi ne, %1, %c0_i32_0 : i32
    scf.if %2 {
      %c0_32 = arith.constant 0 : index
      %c0_33 = arith.constant 0 : index
      %57 = vector.load %arg1[%c0_32, %c0_33] : memref<8x32xf32, #tpu.memory_space<vmem>>, vector<8x32xf32>
      %c0_34 = arith.constant 0 : index
      %c0_35 = arith.constant 0 : index
      %58 = vector.load %arg5[%c0_34, %c0_35] : memref<8x32xf32, #tpu.memory_space<vmem>>, vector<8x32xf32>
      tpu.vector_store %arg5[%c0_34, %c0_35], %57 {strides = array<i32>} : memref<8x32xf32, #tpu.memory_space<vmem>>, vector<8x32xf32>,
    } else {
    }
    %c0 = arith.constant 0 : index
    %c0_1 = arith.constant 0 : index
    %3 = vector.load %arg5[%c0, %c0_1] : memref<8x32xf32, #tpu.memory_space<vmem>>, vector<8x32xf32>
    %c0_2 = arith.constant 0 : index
    %c0_3 = arith.constant 0 : index
    %c0_4 = arith.constant 0 : index
    %4 = vector.load %arg2[%c0_2, %c0_3, %c0_4] : memref<1x32x96xf32, #tpu.memory_space<vmem>>, vector<1x32x96xf32>
    %5 = vector.shape_cast %4 : vector<1x32x96xf32> to vector<32x96xf32>
    %cst = arith.constant dense<0.000000e+00> : vector<8x96xf32>
    %6 = tpu.matmul %3, %5, %cst {dimension_numbers = #tpu.dot_dimension_numbers<[1], [0], [0], [1], [0, 0, 1, 1], [], []>} : vector<8x32xf32>, vector<32x96xf32>, vector<8x96xf32> -> vector<8x96xf32>
    %7 = vector.extract_strided_slice %6 {offsets = [0, 0], sizes = [8, 32], strides = [1, 1]} : vector<8x96xf32> to vector<8x32xf32>
    %8 = vector.extract_strided_slice %6 {offsets = [0, 32], sizes = [8, 32], strides = [1, 1]} : vector<8x96xf32> to vector<8x32xf32>
    %9 = vector.extract_strided_slice %6 {offsets = [0, 64], sizes = [8, 32], strides = [1, 1]} : vector<8x96xf32> to vector<8x32xf32>
    %10 = vector.extract_strided_slice %7 {offsets = [0, 0], sizes = [8, 8], strides = [1, 1]} : vector<8x32xf32> to vector<8x8xf32>
    %11 = vector.extract_strided_slice %8 {offsets = [0, 0], sizes = [8, 8], strides = [1, 1]} : vector<8x32xf32> to vector<8x8xf32>
    %cst_5 = arith.constant dense<0.000000e+00> : vector<8x8xf32>
    %12 = tpu.matmul %10, %11, %cst_5 {dimension_numbers = #tpu.dot_dimension_numbers<[1], [1], [0], [0], [0, 0, 1, 0], [], []>} : vector<8x8xf32>, vector<8x8xf32>, vector<8x8xf32> -> vector<8x8xf32>
    %13 = math.tanh %12 : vector<8x8xf32>
    %14 = vector.extract_strided_slice %9 {offsets = [0, 0], sizes = [8, 8], strides = [1, 1]} : vector<8x32xf32> to vector<8x8xf32>
    %cst_6 = arith.constant dense<0.000000e+00> : vector<8x8xf32>
    %15 = tpu.matmul %13, %14, %cst_6 {dimension_numbers = #tpu.dot_dimension_numbers<[1], [0], [0], [1], [0, 0, 1, 1], [], []>} : vector<8x8xf32>, vector<8x8xf32>, vector<8x8xf32> -> vector<8x8xf32>
    %c0_7 = arith.constant 0 : index
    %c0_8 = arith.constant 0 : index
    %c0_9 = arith.constant 0 : index
    %16 = vector.load %arg3[%c0_7, %c0_8, %c0_9] : memref<1x32x32xf32, #tpu.memory_space<vmem>>, vector<1x8x32xf32>
    %17 = vector.shape_cast %16 : vector<1x8x32xf32> to vector<8x32xf32>
    %cst_10 = arith.constant dense<0.000000e+00> : vector<8x32xf32>
    %18 = tpu.matmul %15, %17, %cst_10 {dimension_numbers = #tpu.dot_dimension_numbers<[1], [0], [0], [1], [0, 0, 1, 1], [], []>} : vector<8x8xf32>, vector<8x32xf32>, vector<8x32xf32> -> vector<8x32xf32>
    %19 = vector.extract_strided_slice %7 {offsets = [0, 8], sizes = [8, 8], strides = [1, 1]} : vector<8x32xf32> to vector<8x8xf32>
    %20 = vector.extract_strided_slice %8 {offsets = [0, 8], sizes = [8, 8], strides = [1, 1]} : vector<8x32xf32> to vector<8x8xf32>
    %cst_11 = arith.constant dense<0.000000e+00> : vector<8x8xf32>
    %21 = tpu.matmul %19, %20, %cst_11 {dimension_numbers = #tpu.dot_dimension_numbers<[1], [1], [0], [0], [0, 0, 1, 0], [], []>} : vector<8x8xf32>, vector<8x8xf32>, vector<8x8xf32> -> vector<8x8xf32>
    %22 = math.tanh %21 : vector<8x8xf32>
    %23 = vector.extract_strided_slice %9 {offsets = [0, 8], sizes = [8, 8], strides = [1, 1]} : vector<8x32xf32> to vector<8x8xf32>
    %cst_12 = arith.constant dense<0.000000e+00> : vector<8x8xf32>
    %24 = tpu.matmul %22, %23, %cst_12 {dimension_numbers = #tpu.dot_dimension_numbers<[1], [0], [0], [1], [0, 0, 1, 1], [], []>} : vector<8x8xf32>, vector<8x8xf32>, vector<8x8xf32> -> vector<8x8xf32>
    %c0_13 = arith.constant 0 : index
    %c8 = arith.constant 8 : index
    %c0_14 = arith.constant 0 : index
    %25 = vector.load %arg3[%c0_13, %c8, %c0_14] : memref<1x32x32xf32, #tpu.memory_space<vmem>>, vector<1x8x32xf32>
    %26 = vector.shape_cast %25 : vector<1x8x32xf32> to vector<8x32xf32>
    %cst_15 = arith.constant dense<0.000000e+00> : vector<8x32xf32>
    %27 = tpu.matmul %24, %26, %cst_15 {dimension_numbers = #tpu.dot_dimension_numbers<[1], [0], [0], [1], [0, 0, 1, 1], [], []>} : vector<8x8xf32>, vector<8x32xf32>, vector<8x32xf32> -> vector<8x32xf32>
    %28 = arith.addf %18, %27 : vector<8x32xf32>
    %29 = vector.extract_strided_slice %7 {offsets = [0, 16], sizes = [8, 8], strides = [1, 1]} : vector<8x32xf32> to vector<8x8xf32>
    %30 = vector.extract_strided_slice %8 {offsets = [0, 16], sizes = [8, 8], strides = [1, 1]} : vector<8x32xf32> to vector<8x8xf32>
    %cst_16 = arith.constant dense<0.000000e+00> : vector<8x8xf32>
    %31 = tpu.matmul %29, %30, %cst_16 {dimension_numbers = #tpu.dot_dimension_numbers<[1], [1], [0], [0], [0, 0, 1, 0], [], []>} : vector<8x8xf32>, vector<8x8xf32>, vector<8x8xf32> -> vector<8x8xf32>
    %32 = math.tanh %31 : vector<8x8xf32>
    %33 = vector.extract_strided_slice %9 {offsets = [0, 16], sizes = [8, 8], strides = [1, 1]} : vector<8x32xf32> to vector<8x8xf32>
    %cst_17 = arith.constant dense<0.000000e+00> : vector<8x8xf32>
    %34 = tpu.matmul %32, %33, %cst_17 {dimension_numbers = #tpu.dot_dimension_numbers<[1], [0], [0], [1], [0, 0, 1, 1], [], []>} : vector<8x8xf32>, vector<8x8xf32>, vector<8x8xf32> -> vector<8x8xf32>
    %c0_18 = arith.constant 0 : index
    %c16 = arith.constant 16 : index
    %c0_19 = arith.constant 0 : index
    %35 = vector.load %arg3[%c0_18, %c16, %c0_19] : memref<1x32x32xf32, #tpu.memory_space<vmem>>, vector<1x8x32xf32>
    %36 = vector.shape_cast %35 : vector<1x8x32xf32> to vector<8x32xf32>
    %cst_20 = arith.constant dense<0.000000e+00> : vector<8x32xf32>
    %37 = tpu.matmul %34, %36, %cst_20 {dimension_numbers = #tpu.dot_dimension_numbers<[1], [0], [0], [1], [0, 0, 1, 1], [], []>} : vector<8x8xf32>, vector<8x32xf32>, vector<8x32xf32> -> vector<8x32xf32>
    %38 = arith.addf %28, %37 : vector<8x32xf32>
    %39 = vector.extract_strided_slice %7 {offsets = [0, 24], sizes = [8, 8], strides = [1, 1]} : vector<8x32xf32> to vector<8x8xf32>
    %40 = vector.extract_strided_slice %8 {offsets = [0, 24], sizes = [8, 8], strides = [1, 1]} : vector<8x32xf32> to vector<8x8xf32>
    %cst_21 = arith.constant dense<0.000000e+00> : vector<8x8xf32>
    %41 = tpu.matmul %39, %40, %cst_21 {dimension_numbers = #tpu.dot_dimension_numbers<[1], [1], [0], [0], [0, 0, 1, 0], [], []>} : vector<8x8xf32>, vector<8x8xf32>, vector<8x8xf32> -> vector<8x8xf32>
    %42 = math.tanh %41 : vector<8x8xf32>
    %43 = vector.extract_strided_slice %9 {offsets = [0, 24], sizes = [8, 8], strides = [1, 1]} : vector<8x32xf32> to vector<8x8xf32>
    %cst_22 = arith.constant dense<0.000000e+00> : vector<8x8xf32>
    %44 = tpu.matmul %42, %43, %cst_22 {dimension_numbers = #tpu.dot_dimension_numbers<[1], [0], [0], [1], [0, 0, 1, 1], [], []>} : vector<8x8xf32>, vector<8x8xf32>, vector<8x8xf32> -> vector<8x8xf32>
    %c0_23 = arith.constant 0 : index
    %c24 = arith.constant 24 : index
    %c0_24 = arith.constant 0 : index
    %45 = vector.load %arg3[%c0_23, %c24, %c0_24] : memref<1x32x32xf32, #tpu.memory_space<vmem>>, vector<1x8x32xf32>
    %46 = vector.shape_cast %45 : vector<1x8x32xf32> to vector<8x32xf32>
    %cst_25 = arith.constant dense<0.000000e+00> : vector<8x32xf32>
    %47 = tpu.matmul %44, %46, %cst_25 {dimension_numbers = #tpu.dot_dimension_numbers<[1], [0], [0], [1], [0, 0, 1, 1], [], []>} : vector<8x8xf32>, vector<8x32xf32>, vector<8x32xf32> -> vector<8x32xf32>
    %48 = arith.addf %38, %47 : vector<8x32xf32>
    %c0_26 = arith.constant 0 : index
    %c0_27 = arith.constant 0 : index
    %c0_28 = arith.constant 0 : index
    %49 = vector.load %arg4[%c0_26, %c0_27, %c0_28] : memref<1x1x32xf32, #tpu.memory_space<vmem>>, vector<1x1x32xf32>
    %50 = vector.shape_cast %49 : vector<1x1x32xf32> to vector<1x32xf32>
    %51 = vector.broadcast %50 : vector<1x32xf32> to vector<8x32xf32>
    %52 = arith.addf %48, %51 : vector<8x32xf32>
    %cst_29 = arith.constant 0.000000e+00 : f32
    %53 = vector.broadcast %cst_29 : f32 to vector<8x32xf32>
    %54 = arith.maximumf %52, %53 : vector<8x32xf32>
    %55 = arith.addf %3, %54 : vector<8x32xf32>
    %c0_30 = arith.constant 0 : index
    %c0_31 = arith.constant 0 : index
    %56 = vector.load %arg5[%c0_30, %c0_31] : memref<8x32xf32, #tpu.memory_space<vmem>>, vector<8x32xf32>
    tpu.vector_store %arg5[%c0_30, %c0_31], %55 {strides = array<i32>} : memref<8x32xf32, #tpu.memory_space<vmem>>, vector<8x32xf32>,
    return
  }
  func.func @transform_0(%arg0: i32) -> (i32, i32) {
    %c0_i32 = arith.constant 0 : i32
    %c0_i32_0 = arith.constant 0 : i32
    %c0_i32_1 = arith.constant 0 : i32
    return %c0_i32, %c0_i32_0 : i32, i32
  }
  func.func @transform_1(%arg0: i32) -> (i32, i32, i32) {
    %c0_i32 = arith.constant 0 : i32
    %c0_i32_0 = arith.constant 0 : i32
    %c0_i32_1 = arith.constant 0 : i32
    return %arg0, %c0_i32, %c0_i32_0 : i32, i32, i32
  }
  func.func @transform_2(%arg0: i32) -> (i32, i32, i32) {
    %c0_i32 = arith.constant 0 : i32
    %c0_i32_0 = arith.constant 0 : i32
    %c0_i32_1 = arith.constant 0 : i32
    return %arg0, %c0_i32, %c0_i32_0 : i32, i32, i32
  }
  func.func @transform_3(%arg0: i32) -> (i32, i32, i32) {
    %c0_i32 = arith.constant 0 : i32
    %c0_i32_0 = arith.constant 0 : i32
    %c0_i32_1 = arith.constant 0 : i32
    return %arg0, %c0_i32, %c0_i32_0 : i32, i32, i32
  }
  func.func @transform_4(%arg0: i32) -> (i32, i32) {
    %c0_i32 = arith.constant 0 : i32
    %c0_i32_0 = arith.constant 0 : i32
    %c0_i32_1 = arith.constant 0 : i32
    return %c0_i32, %c0_i32_0 : i32, i32
  }
}

</mosaic_0001>

<bundles_post_ra>
// kernel: tpu_custom_call.1
= control target key start
LH: loop header
LB: loop body
LE: loop exit
PB: predicated region body
PF: predicated region fallthrough
CT: control target
= control target key end

     0   :  { %9 = vsyncpa [#allocation3], 0  ;;  %s1345_s0 = inlined_call_operand.hbm [shape: f32[8,32], index: 0, kind: input, shape index: {}]   ;;  %s1346_s1 = inlined_call_operand.hbm [shape: f32[3,32,96], index: 1, kind: input, shape index: {}]   ;;  %s1347_s2 = inlined_call_operand.hbm [shape: f32[3,32,32], index: 2, kind: input, shape index: {}]   ;;  %s1348_s3 = inlined_call_operand.hbm [shape: f32[3,1,32], index: 3, kind: input, shape index: {}]   ;;  %s1349_s4 = inlined_call_operand.hbm [shape: f32[8,32], index: 4, kind: output, shape index: {}]  }
   0x1   :  { %10 = vsyncpa [#allocation6], 0 }
   0x2   :  { %12 = vsyncpa [#allocation6 + $0x1], 0 }
   0x3   :  { %13 = vsyncpa [#allocation9], 0 }
   0x4   :  { %15 = vsyncpa [#allocation9 + $0x1], 0 }
   0x5   :  { %16 = vsyncpa [#allocation4], 0  ;;  %s1130_s15 = smov 0   ;;  %s1132_s16 = smov 0  }
   0x6   :  { %s1134_s17 = smov 0   ;;  %s1136_s18 = smov 0  }
   0x7 LB: > { %s1151_s19 = sadd.s32 1, %s1088_s18   ;;  %s50_s20 = sadd.s32 1, %s1084_s17  ;;  %s1088_s18 = sphi %s1136_s18, %s1361_s18   ;;  %s1084_s17 = sphi %s1134_s17, %s1360_s17   ;;  %s1080_s16 = sphi %s1132_s16, %s1359_s16   ;;  %s1076_s15 = sphi %s1130_s15, %s1358_s15  }
   0x8   : > { %s47_s21 = ssub.s32 %s1088_s18, %s1151_s19  ;;  %p57_p0 = scmp.ne.s32.totalorder %s1084_s17, %s1080_s16 }
   0x9   : > { %p48_p1 = scmp.eq.s32.totalorder %s47_s21, 0  ;;  %p58_p2 = scmp.eq.s32.totalorder %s1088_s18, 0 }
   0xa   : > { %p834_p3 = scmp.lt.s32.totalorder %s1088_s18, 3  ;;  %s172_s23 = sand.u32 1, %s1088_s18  }
   0xb   : > { %s1161_s22 = scalar_select %p48_p1, %s1084_s17, %s50_s20  }
   0xc   : > { %p59_p4 = por %p58_p2, %p57_p0  ;;  %s1165_s24 = sand.u32 1, %s1084_s17  }
   0xd   : > { %s771_s25 = sshll.u32 %s1165_s24, 5  ;;  %s803_s26 = sshll.u32 %s1088_s18, 5 }
   0xe   : > { %s181_s29 = scalar_lea.hbm %s1346_s1, %s803_s26  ;;  %s176_s5 = scalar_lea.vmem [#allocation5], %s771_s25 }
   0xf   : > { %s182_s30 = sshll.u32 %s181_s29, 4  ;;  %s184_s6 = sshll.u32 %s176_s5, 4  ;;  %s183_s30 = int_to_ptr.hbm [resolvable:$true] %s182_s30  ;;  %s185_s6 = int_to_ptr.vmem [resolvable:$true] %s184_s6 }
  0x10   : > { %p1176_p5 = pnand %p834_p3, %p59_p4  ;;  %s203_s10 = scalar_lea.hbm %s1347_s2, %s803_s26 }
  0x11   : > { %s1183_s11 = scalar_lea.sflag [#allocation6], %s172_s23  ;;  %s894_s12 = sshra.s32 %s183_s30, 4  ;;  %s895_s12 = int_to_ptr.hbm [resolvable:$true] %s894_s12 }
  0x12   : > { %s896_s13 = scalar_lea.hbm %s895_s12, 32  ;;  %p898_p7 = pneg %p1176_p5 }
  0x13   : > { %p897_p6 = scmp.ne.s32.totalorder %s895_s12, %s896_s13  ;;  %s901_s21 = scalar_lea.hbm %s1346_s1, 96 }
  0x14   : > { %p902_p10 = scmp.lt.s32.totalorder %s895_s12, %s1346_s1  ;;  %p903_p11 = scmp.lt.s32.totalorder %s901_s21, %s896_s13 }
  0x15   : > { %p899_p8 = pnand %p898_p7, %p897_p6 }
  0x16   : > { %p904_p12 = por %p903_p11, %p902_p10 }
  0x17   : > { %p900_p9 = pneg %p899_p8 }
  0x19   : > { %p905_p13 = pnand %p904_p12, %p900_p9 }
  0x1b   : > { %908 = shalt.err (!%p905_p13)
}
  0x1c   : > { %s1350_s23 = smov 128   ;;  %s1351_s26 = smov 8  }
  0x1d   : > { %826 = dma.hbm_to_vmem [thread:$0]  (!%p1176_p5), %s183_s30, 512, %s185_s6, %s1183_s11, %s1350_s23, %s1350_s23, %s1351_s26  }
  0x1e   : > { %s204_s29 = sshll.u32 %s203_s10, 4  ;;  %s198_s5 = scalar_lea.vmem [#allocation7], %s771_s25  ;;  %s1204_s29 = int_to_ptr.hbm [resolvable:$true] %s204_s29 }
  0x1f   : > { %s206_s8 = sshll.u32 %s198_s5, 4  ;;  %s1209_s9 = sadd.s32 4294967295, %s1088_s18   ;;  %s1206_s8 = int_to_ptr.vmem [resolvable:$true] %s206_s8 }
  0x20   : > { %p64_p0 = scmp.eq.s32.totalorder %s1209_s9, 0  ;;  %p63_p1 = scmp.ne.s32.totalorder %s1080_s16, %s1076_s15 }
  0x21   : > { %p768_p2 = scmp.ge.s32.totalorder %s1088_s18, 1  ;;  %p147_p3 = scmp.lt.s32.totalorder %s1088_s18, 4 }
  0x22   : > { %p769_p4 = scmp.ne.s32.totalorder %s1209_s9, 0  ;;  %p1219_p6 = por %p64_p0, %p63_p1 }
  0x23   : > { %s159_s10 = sshll.u32 %s1345_s0, 4  ;;  %p1226_p8 = pnand %p768_p2, %p147_p3  ;;  %s160_s10 = int_to_ptr.hbm [resolvable:$true] %s159_s10 }
  0x24   : > { %s1092_s15 = smov [#allocation2]   ;;  %s222_s27 = scalar_lea.hbm %s1348_s3, %s1088_s18 }
  0x25   : > { %p819_p9 = pneg %p1226_p8  ;;  %s161_s13 = sshll.u32 %s1092_s15, 4  ;;  %s162_s13 = int_to_ptr.vmem [resolvable:$true] %s161_s13 }
  0x26   : > { %s924_s28 = sshra.s32 %s1204_s29, 4  ;;  %s931_s15 = scalar_lea.hbm %s1347_s2, 96  ;;  %s925_s28 = int_to_ptr.hbm [resolvable:$true] %s924_s28 }
  0x27   : > { %p1234_p10 = pnand %p819_p9, %p64_p0  ;;  %s926_s5 = scalar_lea.hbm %s925_s28, 32 }
  0x28   : > { %p927_p11 = scmp.ne.s32.totalorder %s925_s28, %s926_s5  ;;  %p932_p1 = scmp.lt.s32.totalorder %s925_s28, %s1347_s2 }
  0x29   : > { %p933_p2 = scmp.lt.s32.totalorder %s931_s15, %s926_s5 }
  0x2a   : > { %p929_p12 = pnand %p927_p11, %p898_p7 }
  0x2b   : > { %p934_p3 = por %p933_p2, %p932_p1 }
  0x2c   : > { %p930_p13 = pneg %p929_p12 }
  0x2e   : > { %p935_p9 = pnand %p934_p3, %p930_p13 }
  0x30   : > { %938 = shalt.err (!%p935_p9)
}
  0x31   : > { %s1356_s18 = smov 8   ;;  %s1357_s20 = smov 128  }
  0x32   : > { %829 = dma.hbm_to_vmem [thread:$0]  (!%p1176_p5), %s1204_s29, 512, %s1206_s8, %s1183_s11, %s1357_s20, %s1357_s20, %s1356_s18  }
  0x33   : > { %s224_s21 = sshll.u32 %s222_s27, 4  ;;  %s219_s23 = scalar_lea.vmem [#allocation8], %s1165_s24  ;;  %s225_s21 = int_to_ptr.hbm [resolvable:$true] %s224_s21 }
  0x34   : > { %822 = dma.hbm_to_vmem [thread:$0]  (!%p1234_p10), %s160_s10, 128, %s162_s13, [#allocation3]  }
  0x35   : > { %s226_s26 = sshll.u32 %s219_s23, 4  ;;  %s217_s28 = scalar_lea.sflag [#allocation9], %s1165_s24  ;;  %s227_s26 = int_to_ptr.vmem [resolvable:$true] %s226_s26 }
  0x36   : > { %s984_s5 = sshra.s32 %s225_s21, 4  ;;  %s991_s11 = scalar_lea.hbm %s1348_s3, 3  ;;  %s985_s5 = int_to_ptr.hbm [resolvable:$true] %s984_s5 }
  0x37   : > { %s986_s30 = scalar_lea.hbm %s985_s5, 1  ;;  %p992_p10 = scmp.lt.s32.totalorder %s985_s5, %s1348_s3 }
  0x38   : > { %p987_p11 = scmp.ne.s32.totalorder %s985_s5, %s986_s30  ;;  %p993_p1 = scmp.lt.s32.totalorder %s991_s11, %s986_s30 }
  0x3a   : > { %p989_p12 = pnand %p987_p11, %p898_p7  ;;  %p994_p2 = por %p993_p1, %p992_p10 }
  0x3c   : > { %p990_p13 = pneg %p989_p12 }
  0x3e   : > { %p995_p3 = pnand %p994_p2, %p990_p13 }
  0x40   : > { %998 = shalt.err (!%p995_p3)
}
  0x41   : > { %832 = dma.hbm_to_vmem [thread:$0]  (!%p1176_p5), %s225_s21, 16, %s227_s26, %s217_s28  }
  0x42   : > { %235 = sbr.rel (%p1226_p8) target bundleno = 1021 (0x3fd), region = 36 }
  0x47   : > { %1059 = dma.done.wait (%p64_p0), [#allocation3], 128  }
  0x48   : > { %1061 = vsyncadd (%p64_p0), [#allocation3], 4294967168  ;;  %s242_s24 = sand.u32 1, %s1209_s9   ;;  %s1283_s10 = sand.u32 1, %s1080_s16  }
  0x49   : > { %s779_s13 = sshll.u32 %s1283_s10, 5  ;;  %s243_s14 = scalar_lea.sflag [#allocation6], %s242_s24 }
  0x4a   : > { %s246_s7 = scalar_lea.vmem [#allocation5], %s779_s13 }
  0x4b   : > { %1063 = dma.done.wait (%p1219_p6), %s243_s14, 1024  }
  0x4c   : > { %1065 = vsyncadd (%p1219_p6), %s243_s14, 4294966272  ;;  %s1290_s12 = scalar_lea.vmem [#allocation7], %s779_s13  ;;  %s263_s27 = scalar_lea.sflag [#allocation9], %s1283_s10 }
  0x4d   : > { %s265_s18 = scalar_lea.vmem [#allocation8], %s1283_s10 }
  0x4e   : > { %1067 = dma.done.wait (%p1219_p6), %s263_s27, 16  }
  0x4f   : > { %1069 = vsyncadd (%p1219_p6), %s263_s27, 4294967280  ;;  %298 = sbr.rel (%p769_p4) target bundleno = 86 (0x56), region = 56 }
  0x54   : > { %v299_v0 = vld [vmem:[#allocation2] sm:$0xff]  ;;  %vm300_vm0 = vcmask 261120  }
  0x55   : > { %301 = vst.msk [vmem:[#allocation10] sm:$0xff] %vm300_vm0, %v299_v0 }
  0x56 PF: > { %v306_v1 = vld [vmem:[%s246_s7 + $0x18] sm:$0xff]  ;;  %v305_v2 = vld [vmem:[%s246_s7 + $0x10] sm:$0xff]  ;;  %v304_v3 = vld [vmem:[%s246_s7 + $0x8] sm:$0xff]  ;;  %vm307_vm1 = vcmask 261120   ;;  %s1093_s25 = smov 72   ;;  %s1094_s20 = smov 88  }
  0x57   : > { %323 = vmatpush.msra.mxu0 %v306_v1  ;;  %v303_v4 = vld [vmem:[%s246_s7] sm:$0xff]  ;;  %s1095_s21 = smov 96   ;;  %s1096_s23 = smov 104   ;;  %vm334_vm2 = vcmask 64512   ;;  %v442_v25 = vld [vmem:[%s1290_s12 + $0x8] sm:$0xff]  ;;  %v544_v26 = vld [vmem:[%s1290_s12 + $0x10] sm:$0xff] }
  0x58   : > { %s1097_s26 = smov 120   ;;  %s1098_s28 = smov 64   ;;  %v386_v8 = vld [vmem:[%s1290_s12] sm:$0xff]  ;;  %v624_v30 = vld [vmem:[%s1290_s12 + $0x18] sm:$0xff] }
  0x59   : > { %324 = vmatpush.msra.mxu0 %v305_v2  ;;  %s1099_s5 = smov 56   ;;  %s1100_s30 = smov 112   ;;  %v885_v39 = vld [vmem:[%s265_s18] ss:$0 sm:$0xff] }
  0x5a   : > { %s1101_s6 = smov 80   ;;  %s1102_s15 = smov 40  }
  0x5b   : > { %325 = vmatpush.msra.mxu0 %v304_v3  ;;  %s1103_s11 = smov 48   ;;  %s1104_s29 = smov [#allocation10]  }
  0x5c   : > { %v1300_v5 = vld [vmem:[#allocation10] sm:$0xff]  ;;  %s663_s8 = sshll.u32 %s1104_s29, 4  ;;  %s665_s14 = sshll.u32 %s1349_s4, 4  ;;  %s664_s8 = int_to_ptr.vmem [resolvable:$true] %s663_s8  ;;  %s666_s14 = int_to_ptr.hbm [resolvable:$true] %s665_s14 }
  0x5d   : > { %326 = vmatpush.msra.mxu0 %v303_v4  ;;  %p836_p5 = scmp.eq.s32.totalorder %s1209_s9, 2 }
  0x5e   : > { %782 = vmatmul.msk.f32.vlgmr.msra.gmra.mxu0 %vm307_vm1, %v1300_v5 }
  0xdb   : > { %v328_v6 = vpop.f32.mrf.mxu0 }
  0xdc   : > { %571 = vrot.lane.b32.xlu2 %v328_v6, %s1093_s25  ;;  %389 = vrot.lane.b32.xlu1 %v328_v6, %s1094_s20 }
  0xdd   : > { %332 = vrot.lane.b32.xlu0 %v328_v6, %s1095_s21 }
  0xe4   : > { %569 = vrot.lane.b32.xlu2 %v328_v6, %s1096_s23  ;;  %387 = vrot.lane.b32.xlu1 %v328_v6, %s1097_s26 }
  0xe5   : > { %360 = vrot.lane.b32.xlu0 %v328_v6, %s1098_s28 }
  0xec   : > { %416 = vrot.lane.b32.xlu2 %v328_v6, %s1099_s5  ;;  %489 = vrot.lane.b32.xlu1 %v328_v6, %s1100_s30 }
  0xed   : > { %491 = vrot.lane.b32.xlu0 %v328_v6, %s1101_s6 }
  0xf4   : > { %598 = vrot.lane.b32.xlu1 %v328_v6, %s1102_s15 }
  0xf5   : > { %518 = vrot.lane.b32.xlu0 %v328_v6, %s1103_s11 }
 0x136   : > { %v572_v7 = vpop.permute.xlu2 %571 }
 0x13e   : > { %v570_v9 = vpop.permute.xlu2 %569 }
 0x146   : > { %v417_v14 = vpop.permute.xlu2 %416 }
 0x14e   : > { %v390_v10 = vpop.permute.xlu1 %389 }
 0x14f   : > { %v333_v11 = vpop.permute.xlu0 %332  ;;  %786 = vmatpush.xpose.msk.msra.mxu3 %vm334_vm2, %v390_v10 }
 0x150   : > { %783 = vmatpush.xpose.msk.msra.mxu1 %vm334_vm2, %v333_v11 }
 0x153   : > { %484 = vmatpush.msrb.mxu3 %v386_v8  ;;  %784 = vmatmul.msk.f32.vlgmr.msra.gmra.mxu1 %vm334_vm2, %v328_v6 }
 0x154   : > { %461 = vmatpush.msrb.mxu1 %v442_v25 }
 0x156   : > { %v388_v12 = vpop.permute.xlu1 %387  ;;  %563 = vmatpush.msra.mxu1 %v544_v26 }
 0x157   : > { %v361_v13 = vpop.permute.xlu0 %360  ;;  %787 = vmatmul.msk.f32.vlgmr.msra.gmra.mxu3 %vm334_vm2, %v388_v12 }
 0x158   : > { %381 = vmatpush.msra.mxu2 %v361_v13  ;;  %795 = vmatpush.xpose.msk.msra.mxu3 %vm334_vm2, %v572_v7 }
 0x15a   : > { %437 = vmatpush.msrb.mxu2 %v417_v14 }
 0x15e   : > { %v490_v15 = vpop.permute.xlu1 %489 }
 0x15f   : > { %v492_v16 = vpop.permute.xlu0 %491 }
 0x160   : > { %791 = vmatpush.xpose.msk.msrb.mxu0 %vm334_vm2, %v492_v16 }
 0x163   : > { %792 = vmatmul.msk.f32.vlgmr.msrb.gmra.mxu0 %vm334_vm2, %v490_v15 }
 0x166   : > { %v599_v17 = vpop.permute.xlu1 %598 }
 0x167   : > { %619 = vmatpush.msra.mxu0 %v599_v17  ;;  %v519_v20 = vpop.permute.xlu0 %518 }
 0x1d0   : > { %v356_v18 = vpop.f32.mrf.mxu1 }
 0x1d1   : > { %886 = vtanh.f32 %v356_v18 }
 0x1d7   : > { %v887_v19 = vpop.eup %886 }
 0x1d8   : > { %785 = vmatmul.msk.f32.vlgmr.msra.gmra.mxu2 %vm334_vm2, %v887_v19 }
 0x1d9   : > { %539 = vmatpush.msra.mxu2 %v519_v20 }
 0x1da   : > { %v412_v21 = vpop.f32.mrf.mxu3 }
 0x1db   : > { %888 = vtanh.f32 %v412_v21 }
 0x1e0   : > { %v514_v22 = vpop.f32.mrf.mxu0 }
 0x1e1   : > { %v889_v23 = vpop.eup %888  ;;  %890 = vtanh.f32 %v514_v22 }
 0x1e2   : > { %788 = vmatmul.msk.f32.vlgmr.msrb.gmra.mxu2 %vm334_vm2, %v889_v23 }
 0x1e3   : > { %643 = vmatpush.msrb.mxu2 %v624_v30 }
 0x1e7   : > { %v891_v24 = vpop.eup %890 }
 0x1ea   : > { %793 = vmatmul.msk.f32.vlgmr.msra.gmra.mxu2 %vm334_vm2, %v891_v24 }
 0x25b   : > { %v383_v27 = vpop.f32.mrf.mxu2 }
 0x25c   : > { %790 = vmatmul.msk.f32.vlgmr.msrb.gmra.mxu3 %vm334_vm2, %v383_v27 }
 0x264   : > { %796 = vmatmul.msk.f32.vlgmr.msra.gmra.mxu3 %vm334_vm2, %v570_v9 }
 0x265   : > { %v439_v28 = vpop.f32.mrf.mxu2 }
 0x266   : > { %789 = vmatmul.msk.f32.vlgmr.msrb.gmra.mxu1 %vm334_vm2, %v439_v28 }
 0x26d   : > { %v541_v29 = vpop.f32.mrf.mxu2 }
 0x26e   : > { %794 = vmatmul.msk.f32.vlgmr.msra.gmra.mxu1 %vm334_vm2, %v541_v29 }
 0x2df   : > { %v486_v31 = vpop.f32.mrf.mxu3 }
 0x2e3   : > { %v463_v35 = vpop.f32.mrf.mxu1 }
 0x2e4   : > { %v487_v37 = vadd.f32 %v486_v31, %v463_v35 }
 0x2e7   : > { %v594_v32 = vpop.f32.mrf.mxu3 }
 0x2e8   : > { %892 = vtanh.f32 %v594_v32 }
 0x2eb   : > { %v565_v36 = vpop.f32.mrf.mxu1 }
 0x2ec   : > { %v568_v38 = vadd.f32 %v565_v36, %v487_v37 }
 0x2ee   : > { %v893_v33 = vpop.eup %892 }
 0x2ef   : > { %797 = vmatmul.msk.f32.vlgmr.msra.gmra.mxu0 %vm334_vm2, %v893_v33 }
 0x36c   : > { %v621_v34 = vpop.f32.mrf.mxu0 }
 0x36d   : > { %798 = vmatmul.msk.f32.vlgmr.msrb.gmra.mxu2 %vm334_vm2, %v621_v34 }
 0x3f0   : > { %v645_v40 = vpop.f32.mrf.mxu2 }
 0x3f1   : > { %v648_v41 = vadd.f32 %v645_v40, %v568_v38 }
 0x3f3   : > { %v653_v42 = vadd.f32 %v885_v39, %v648_v41 }
 0x3f5   : > { %v654_v43 = vmax.f32 %v653_v42, 0.0 }
 0x3f7   : > { %v655_v44 = vadd.f32 %v654_v43, %v1300_v5 }
 0x3f9   : > { %656 = vst.msk [vmem:[#allocation10] sm:$0xff] %vm307_vm1, %v655_v44 }
 0x3fa   : > { %816 = dma.vmem_to_hbm [thread:$0]  (%p836_p5), %s664_s8, 128, %s666_s14, [#allocation4]  }
 0x3fb   : > { %1071 = dma.done.wait (%p836_p5), [#allocation4], 128  }
 0x3fc   : > { %1073 = vsyncadd (%p836_p5), [#allocation4], 4294967168 }
 0x3fd PF: > { %p19_p7 = scmp.ge.s32.totalorder %s1151_s19, 5   ;;  %s1358_s15 = smov %s1080_s16 }
 0x3fe   : > { %s1359_s16 = smov %s1084_s17  ;;  %s1360_s17 = smov %s1161_s22 }
 0x3ff   : > { %s1361_s18 = smov %s1151_s19  ;;  %21 = sbr.rel (!%p19_p7) target bundleno = 7 (0x7), region = 106 }
 0x404   :  { %679 = vsyncpa [#allocation3], 1 }
 0x405   :  { %681 = vsyncpa [#allocation3 + $0x1], 1 }
 0x406   :  { %682 = vsyncpa [#allocation6], 1 }
 0x407   :  { %684 = vsyncpa [#allocation6 + $0x1], 1 }
 0x408   :  { %685 = vsyncpa [#allocation9], 1 }
 0x409   :  { %687 = vsyncpa [#allocation9 + $0x1], 1 }
 0x40a   :  { %688 = vsyncpa [#allocation4], 1 }
 0x40b   :  { %690 = vsyncpa [#allocation4 + $0x1], 1 }

</bundles_post_ra>
